<compile_context>
chip_gen: v5e
topology: v5e:2x2
jax: 0.10.0
libtpu: 0.0.40
codegen_flags: <defaults>
</compile_context>

<pallas_src>
import jax
import jax.numpy as jnp
from jax import lax
from jax.experimental import pallas as pl
from jax.experimental.pallas import tpu as pltpu


def _expand_evecs_kernel(x_ref, o_ref):
    # x_ref: [1, C, N, K]      all eigenvectors for one batch element (loaded once)
    # o_ref: [1, L*C, N, N]    all L low-rank approximations for that batch element
    x = x_ref[0].astype(jnp.float32)                     # (C, N, K)
    C, N, K = x.shape
    L = o_ref.shape[1] // C

    # Column indices along K, built in-kernel (no captured host constants), hoisted
    # out of the unrolled level loop.
    col = lax.broadcasted_iota(jnp.int32, (1, 1, K), dimension=2)   # (1, 1, K)

    g = None
    for lvl in range(L):                                 # L static -> fully unrolled
        if lvl < K:
            if lvl + 1 < K:
                # Zero out eigenvector columns k > lvl (cheap VPU select).
                xm = jnp.where(col <= lvl, x, jnp.float32(0.0))     # (C, N, K)
            else:
                xm = x                                   # full rank, no masking needed
            # X[..., :lvl+1] @ X[..., :lvl+1]^T == (X*mask) @ X^T, batched over C.
            # einsum contracts the trailing K axes directly on the MXU.
            g = jnp.einsum("cnk,cmk->cnm", xm, x,
                           preferred_element_type=jnp.float32)      # (C, N, N)
        # lvl >= K: torch slice [..., :lvl+1] saturates at K columns -> result identical
        # to level K-1; just re-store the saturated gram (no recompute).
        o_ref[0, lvl * C:(lvl + 1) * C] = g.astype(o_ref.dtype)


def expand_evecs(evecs: jax.Array, max_lvl=16) -> jax.Array:
    """evecs: [B, C, N, K] float -> [B, max_lvl*C, N, N] float32 (torch.cat ordering)."""
    B, C, N, K = evecs.shape
    if max_lvl is None:                                  # mirrors the PyTorch module
        max_lvl = K
    L = max_lvl

    # VMEM budget: double-buffered input + output blocks with lane-padding headroom
    # (last dim pads to 128 lanes when smaller).  Cap at a v7x-safe 64 MiB.
    itemsize = 4
    in_block = C * N * max(K, 128) * itemsize
    out_block = L * C * N * max(N, 128) * itemsize
    vmem_limit = int(min(max(32 * 1024 * 1024,
                             2 * (in_block + out_block) + (1 << 20)),
                         64 * 1024 * 1024))

    return pl.pallas_call(
        _expand_evecs_kernel,
        out_shape=jax.ShapeDtypeStruct((B, L * C, N, N), jnp.float32),
        grid_spec=pltpu.PrefetchScalarGridSpec(
            num_scalar_prefetch=0,
            grid=(B,),                                   # one coarse step per batch element
            in_specs=[
                pl.BlockSpec((1, C, N, K), lambda b: (b, 0, 0, 0)),
            ],
            out_specs=pl.BlockSpec((1, L * C, N, N), lambda b: (b, 0, 0, 0)),
        ),
        compiler_params=pltpu.CompilerParams(
            dimension_semantics=("parallel",),           # shard batches across TCs
            vmem_limit_bytes=vmem_limit,
        ),
    )(evecs)


def _reference(evecs: jnp.ndarray, max_lvl: int) -> jnp.ndarray:
    lras = []
    for lvl in range(max_lvl):
        fe = evecs[:, :, :, : lvl + 1]
        lras.append(jnp.matmul(fe, jnp.swapaxes(fe, -1, -2)))
    return jnp.concatenate(lras, axis=1)


if __name__ == "__main__":
    B, C, N, K = 2, 2, 16, 8
    MAX_LVL = 8

    key = jax.random.PRNGKey(0)
    evecs = jax.random.normal(key, (B, C, N, K), dtype=jnp.float32)

    cube = expand_evecs(evecs, max_lvl=MAX_LVL)
    cube = jax.block_until_ready(cube)

    ref = _reference(evecs, MAX_LVL)
    assert cube.shape == (B, MAX_LVL * C, N, N), cube.shape
    assert jnp.allclose(cube, ref, atol=1e-5, rtol=1e-5), "mismatch vs reference"

    print("KERNEL_OK")
</pallas_src>

<mosaic_0001>
module attributes {stable_mosaic.version = 11 : i64} {
  func.func @_expand_evecs_kernel(%arg0: i32, %arg1: memref<1x2x16x8xf32, #tpu.memory_space<vmem>>, %arg2: memref<1x16x16x16xf32, #tpu.memory_space<vmem>>) attributes {dimension_semantics = [#tpu.dimension_semantics<parallel>], iteration_bounds = array<i64: 2>, scalar_prefetch = 0 : i64, scratch_operands = 0 : i64, tpu.core_type = #tpu.core_type<tc>, window_params = [{transform_indices = @transform_0, window_bounds = array<i64: 1, 2, 16, 8>}, {transform_indices = @transform_1, window_bounds = array<i64: 1, 16, 16, 16>}]} {
    %c0 = arith.constant 0 : index
    %c0_0 = arith.constant 0 : index
    %c0_1 = arith.constant 0 : index
    %c0_2 = arith.constant 0 : index
    %0 = vector.load %arg1[%c0, %c0_0, %c0_1, %c0_2] : memref<1x2x16x8xf32, #tpu.memory_space<vmem>>, vector<1x2x16x8xf32>
    %1 = vector.shape_cast %0 : vector<1x2x16x8xf32> to vector<2x16x8xf32>
    %2 = tpu.iota {dimensions = array<i32: 2>} : vector<1x1x8xi32>
    %c0_i32 = arith.constant 0 : i32
    %3 = vector.broadcast %c0_i32 : i32 to vector<1x1x8xi32>
    %4 = arith.cmpi sle, %2, %3 : vector<1x1x8xi32>
    %cst = arith.constant 0.000000e+00 : f32
    %5 = vector.shape_cast %4 : vector<1x1x8xi1> to vector<1x1x8xi1>
    %6 = vector.broadcast %5 : vector<1x1x8xi1> to vector<2x16x8xi1>
    %7 = vector.broadcast %cst : f32 to vector<2x16x8xf32>
    %8 = arith.select %6, %1, %7 : vector<2x16x8xi1>, vector<2x16x8xf32>
    "tpu.trace_start"() <{level = 10 : i32, message = "cnk,cmk->cnm"}> : () -> ()
    %cst_3 = arith.constant dense<0.000000e+00> : vector<2x16x16xf32>
    %9 = tpu.matmul %8, %1, %cst_3 {dimension_numbers = #tpu.dot_dimension_numbers<[2], [2], [1], [1], [0, 0, 0, 1, 1, 1], [0], [0]>} : vector<2x16x8xf32>, vector<2x16x8xf32>, vector<2x16x16xf32> -> vector<2x16x16xf32>
    "tpu.trace_stop"() : () -> ()
    %c0_4 = arith.constant 0 : index
    %c0_5 = arith.constant 0 : index
    %c0_6 = arith.constant 0 : index
    %c0_7 = arith.constant 0 : index
    %10 = vector.load %arg2[%c0_4, %c0_5, %c0_6, %c0_7] : memref<1x16x16x16xf32, #tpu.memory_space<vmem>>, vector<1x2x16x16xf32>
    %11 = vector.shape_cast %10 : vector<1x2x16x16xf32> to vector<2x16x16xf32>
    %12 = vector.shape_cast %9 : vector<2x16x16xf32> to vector<1x2x16x16xf32>
    tpu.vector_store %arg2[%c0_4, %c0_5, %c0_6, %c0_7], %12 {strides = array<i32>} : memref<1x16x16x16xf32, #tpu.memory_space<vmem>>, vector<1x2x16x16xf32>,
    %c1_i32 = arith.constant 1 : i32
    %13 = vector.broadcast %c1_i32 : i32 to vector<1x1x8xi32>
    %14 = arith.cmpi sle, %2, %13 : vector<1x1x8xi32>
    %cst_8 = arith.constant 0.000000e+00 : f32
    %15 = vector.shape_cast %14 : vector<1x1x8xi1> to vector<1x1x8xi1>
    %16 = vector.broadcast %15 : vector<1x1x8xi1> to vector<2x16x8xi1>
    %17 = vector.broadcast %cst_8 : f32 to vector<2x16x8xf32>
    %18 = arith.select %16, %1, %17 : vector<2x16x8xi1>, vector<2x16x8xf32>
    "tpu.trace_start"() <{level = 10 : i32, message = "cnk,cmk->cnm"}> : () -> ()
    %cst_9 = arith.constant dense<0.000000e+00> : vector<2x16x16xf32>
    %19 = tpu.matmul %18, %1, %cst_9 {dimension_numbers = #tpu.dot_dimension_numbers<[2], [2], [1], [1], [0, 0, 0, 1, 1, 1], [0], [0]>} : vector<2x16x8xf32>, vector<2x16x8xf32>, vector<2x16x16xf32> -> vector<2x16x16xf32>
    "tpu.trace_stop"() : () -> ()
    %c0_10 = arith.constant 0 : index
    %c2 = arith.constant 2 : index
    %c0_11 = arith.constant 0 : index
    %c0_12 = arith.constant 0 : index
    %20 = vector.load %arg2[%c0_10, %c2, %c0_11, %c0_12] : memref<1x16x16x16xf32, #tpu.memory_space<vmem>>, vector<1x2x16x16xf32>
    %21 = vector.shape_cast %20 : vector<1x2x16x16xf32> to vector<2x16x16xf32>
    %22 = vector.shape_cast %19 : vector<2x16x16xf32> to vector<1x2x16x16xf32>
    tpu.vector_store %arg2[%c0_10, %c2, %c0_11, %c0_12], %22 {strides = array<i32>} : memref<1x16x16x16xf32, #tpu.memory_space<vmem>>, vector<1x2x16x16xf32>,
    %c2_i32 = arith.constant 2 : i32
    %23 = vector.broadcast %c2_i32 : i32 to vector<1x1x8xi32>
    %24 = arith.cmpi sle, %2, %23 : vector<1x1x8xi32>
    %cst_13 = arith.constant 0.000000e+00 : f32
    %25 = vector.shape_cast %24 : vector<1x1x8xi1> to vector<1x1x8xi1>
    %26 = vector.broadcast %25 : vector<1x1x8xi1> to vector<2x16x8xi1>
    %27 = vector.broadcast %cst_13 : f32 to vector<2x16x8xf32>
    %28 = arith.select %26, %1, %27 : vector<2x16x8xi1>, vector<2x16x8xf32>
    "tpu.trace_start"() <{level = 10 : i32, message = "cnk,cmk->cnm"}> : () -> ()
    %cst_14 = arith.constant dense<0.000000e+00> : vector<2x16x16xf32>
    %29 = tpu.matmul %28, %1, %cst_14 {dimension_numbers = #tpu.dot_dimension_numbers<[2], [2], [1], [1], [0, 0, 0, 1, 1, 1], [0], [0]>} : vector<2x16x8xf32>, vector<2x16x8xf32>, vector<2x16x16xf32> -> vector<2x16x16xf32>
    "tpu.trace_stop"() : () -> ()
    %c0_15 = arith.constant 0 : index
    %c4 = arith.constant 4 : index
    %c0_16 = arith.constant 0 : index
    %c0_17 = arith.constant 0 : index
    %30 = vector.load %arg2[%c0_15, %c4, %c0_16, %c0_17] : memref<1x16x16x16xf32, #tpu.memory_space<vmem>>, vector<1x2x16x16xf32>
    %31 = vector.shape_cast %30 : vector<1x2x16x16xf32> to vector<2x16x16xf32>
    %32 = vector.shape_cast %29 : vector<2x16x16xf32> to vector<1x2x16x16xf32>
    tpu.vector_store %arg2[%c0_15, %c4, %c0_16, %c0_17], %32 {strides = array<i32>} : memref<1x16x16x16xf32, #tpu.memory_space<vmem>>, vector<1x2x16x16xf32>,
    %c3_i32 = arith.constant 3 : i32
    %33 = vector.broadcast %c3_i32 : i32 to vector<1x1x8xi32>
    %34 = arith.cmpi sle, %2, %33 : vector<1x1x8xi32>
    %cst_18 = arith.constant 0.000000e+00 : f32
    %35 = vector.shape_cast %34 : vector<1x1x8xi1> to vector<1x1x8xi1>
    %36 = vector.broadcast %35 : vector<1x1x8xi1> to vector<2x16x8xi1>
    %37 = vector.broadcast %cst_18 : f32 to vector<2x16x8xf32>
    %38 = arith.select %36, %1, %37 : vector<2x16x8xi1>, vector<2x16x8xf32>
    "tpu.trace_start"() <{level = 10 : i32, message = "cnk,cmk->cnm"}> : () -> ()
    %cst_19 = arith.constant dense<0.000000e+00> : vector<2x16x16xf32>
    %39 = tpu.matmul %38, %1, %cst_19 {dimension_numbers = #tpu.dot_dimension_numbers<[2], [2], [1], [1], [0, 0, 0, 1, 1, 1], [0], [0]>} : vector<2x16x8xf32>, vector<2x16x8xf32>, vector<2x16x16xf32> -> vector<2x16x16xf32>
    "tpu.trace_stop"() : () -> ()
    %c0_20 = arith.constant 0 : index
    %c6 = arith.constant 6 : index
    %c0_21 = arith.constant 0 : index
    %c0_22 = arith.constant 0 : index
    %40 = vector.load %arg2[%c0_20, %c6, %c0_21, %c0_22] : memref<1x16x16x16xf32, #tpu.memory_space<vmem>>, vector<1x2x16x16xf32>
    %41 = vector.shape_cast %40 : vector<1x2x16x16xf32> to vector<2x16x16xf32>
    %42 = vector.shape_cast %39 : vector<2x16x16xf32> to vector<1x2x16x16xf32>
    tpu.vector_store %arg2[%c0_20, %c6, %c0_21, %c0_22], %42 {strides = array<i32>} : memref<1x16x16x16xf32, #tpu.memory_space<vmem>>, vector<1x2x16x16xf32>,
    %c4_i32 = arith.constant 4 : i32
    %43 = vector.broadcast %c4_i32 : i32 to vector<1x1x8xi32>
    %44 = arith.cmpi sle, %2, %43 : vector<1x1x8xi32>
    %cst_23 = arith.constant 0.000000e+00 : f32
    %45 = vector.shape_cast %44 : vector<1x1x8xi1> to vector<1x1x8xi1>
    %46 = vector.broadcast %45 : vector<1x1x8xi1> to vector<2x16x8xi1>
    %47 = vector.broadcast %cst_23 : f32 to vector<2x16x8xf32>
    %48 = arith.select %46, %1, %47 : vector<2x16x8xi1>, vector<2x16x8xf32>
    "tpu.trace_start"() <{level = 10 : i32, message = "cnk,cmk->cnm"}> : () -> ()
    %cst_24 = arith.constant dense<0.000000e+00> : vector<2x16x16xf32>
    %49 = tpu.matmul %48, %1, %cst_24 {dimension_numbers = #tpu.dot_dimension_numbers<[2], [2], [1], [1], [0, 0, 0, 1, 1, 1], [0], [0]>} : vector<2x16x8xf32>, vector<2x16x8xf32>, vector<2x16x16xf32> -> vector<2x16x16xf32>
    "tpu.trace_stop"() : () -> ()
    %c0_25 = arith.constant 0 : index
    %c8 = arith.constant 8 : index
    %c0_26 = arith.constant 0 : index
    %c0_27 = arith.constant 0 : index
    %50 = vector.load %arg2[%c0_25, %c8, %c0_26, %c0_27] : memref<1x16x16x16xf32, #tpu.memory_space<vmem>>, vector<1x2x16x16xf32>
    %51 = vector.shape_cast %50 : vector<1x2x16x16xf32> to vector<2x16x16xf32>
    %52 = vector.shape_cast %49 : vector<2x16x16xf32> to vector<1x2x16x16xf32>
    tpu.vector_store %arg2[%c0_25, %c8, %c0_26, %c0_27], %52 {strides = array<i32>} : memref<1x16x16x16xf32, #tpu.memory_space<vmem>>, vector<1x2x16x16xf32>,
    %c5_i32 = arith.constant 5 : i32
    %53 = vector.broadcast %c5_i32 : i32 to vector<1x1x8xi32>
    %54 = arith.cmpi sle, %2, %53 : vector<1x1x8xi32>
    %cst_28 = arith.constant 0.000000e+00 : f32
    %55 = vector.shape_cast %54 : vector<1x1x8xi1> to vector<1x1x8xi1>
    %56 = vector.broadcast %55 : vector<1x1x8xi1> to vector<2x16x8xi1>
    %57 = vector.broadcast %cst_28 : f32 to vector<2x16x8xf32>
    %58 = arith.select %56, %1, %57 : vector<2x16x8xi1>, vector<2x16x8xf32>
    "tpu.trace_start"() <{level = 10 : i32, message = "cnk,cmk->cnm"}> : () -> ()
    %cst_29 = arith.constant dense<0.000000e+00> : vector<2x16x16xf32>
    %59 = tpu.matmul %58, %1, %cst_29 {dimension_numbers = #tpu.dot_dimension_numbers<[2], [2], [1], [1], [0, 0, 0, 1, 1, 1], [0], [0]>} : vector<2x16x8xf32>, vector<2x16x8xf32>, vector<2x16x16xf32> -> vector<2x16x16xf32>
    "tpu.trace_stop"() : () -> ()
    %c0_30 = arith.constant 0 : index
    %c10 = arith.constant 10 : index
    %c0_31 = arith.constant 0 : index
    %c0_32 = arith.constant 0 : index
    %60 = vector.load %arg2[%c0_30, %c10, %c0_31, %c0_32] : memref<1x16x16x16xf32, #tpu.memory_space<vmem>>, vector<1x2x16x16xf32>
    %61 = vector.shape_cast %60 : vector<1x2x16x16xf32> to vector<2x16x16xf32>
    %62 = vector.shape_cast %59 : vector<2x16x16xf32> to vector<1x2x16x16xf32>
    tpu.vector_store %arg2[%c0_30, %c10, %c0_31, %c0_32], %62 {strides = array<i32>} : memref<1x16x16x16xf32, #tpu.memory_space<vmem>>, vector<1x2x16x16xf32>,
    %c6_i32 = arith.constant 6 : i32
    %63 = vector.broadcast %c6_i32 : i32 to vector<1x1x8xi32>
    %64 = arith.cmpi sle, %2, %63 : vector<1x1x8xi32>
    %cst_33 = arith.constant 0.000000e+00 : f32
    %65 = vector.shape_cast %64 : vector<1x1x8xi1> to vector<1x1x8xi1>
    %66 = vector.broadcast %65 : vector<1x1x8xi1> to vector<2x16x8xi1>
    %67 = vector.broadcast %cst_33 : f32 to vector<2x16x8xf32>
    %68 = arith.select %66, %1, %67 : vector<2x16x8xi1>, vector<2x16x8xf32>
    "tpu.trace_start"() <{level = 10 : i32, message = "cnk,cmk->cnm"}> : () -> ()
    %cst_34 = arith.constant dense<0.000000e+00> : vector<2x16x16xf32>
    %69 = tpu.matmul %68, %1, %cst_34 {dimension_numbers = #tpu.dot_dimension_numbers<[2], [2], [1], [1], [0, 0, 0, 1, 1, 1], [0], [0]>} : vector<2x16x8xf32>, vector<2x16x8xf32>, vector<2x16x16xf32> -> vector<2x16x16xf32>
    "tpu.trace_stop"() : () -> ()
    %c0_35 = arith.constant 0 : index
    %c12 = arith.constant 12 : index
    %c0_36 = arith.constant 0 : index
    %c0_37 = arith.constant 0 : index
    %70 = vector.load %arg2[%c0_35, %c12, %c0_36, %c0_37] : memref<1x16x16x16xf32, #tpu.memory_space<vmem>>, vector<1x2x16x16xf32>
    %71 = vector.shape_cast %70 : vector<1x2x16x16xf32> to vector<2x16x16xf32>
    %72 = vector.shape_cast %69 : vector<2x16x16xf32> to vector<1x2x16x16xf32>
    tpu.vector_store %arg2[%c0_35, %c12, %c0_36, %c0_37], %72 {strides = array<i32>} : memref<1x16x16x16xf32, #tpu.memory_space<vmem>>, vector<1x2x16x16xf32>,
    "tpu.trace_start"() <{level = 10 : i32, message = "cnk,cmk->cnm"}> : () -> ()
    %cst_38 = arith.constant dense<0.000000e+00> : vector<2x16x16xf32>
    %73 = tpu.matmul %1, %1, %cst_38 {dimension_numbers = #tpu.dot_dimension_numbers<[2], [2], [1], [1], [0, 0, 0, 1, 1, 1], [0], [0]>} : vector<2x16x8xf32>, vector<2x16x8xf32>, vector<2x16x16xf32> -> vector<2x16x16xf32>
    "tpu.trace_stop"() : () -> ()
    %c0_39 = arith.constant 0 : index
    %c14 = arith.constant 14 : index
    %c0_40 = arith.constant 0 : index
    %c0_41 = arith.constant 0 : index
    %74 = vector.load %arg2[%c0_39, %c14, %c0_40, %c0_41] : memref<1x16x16x16xf32, #tpu.memory_space<vmem>>, vector<1x2x16x16xf32>
    %75 = vector.shape_cast %74 : vector<1x2x16x16xf32> to vector<2x16x16xf32>
    %76 = vector.shape_cast %73 : vector<2x16x16xf32> to vector<1x2x16x16xf32>
    tpu.vector_store %arg2[%c0_39, %c14, %c0_40, %c0_41], %76 {strides = array<i32>} : memref<1x16x16x16xf32, #tpu.memory_space<vmem>>, vector<1x2x16x16xf32>,
    return
  }
  func.func @transform_0(%arg0: i32) -> (i32, i32, i32, i32) {
    %c0_i32 = arith.constant 0 : i32
    %c0_i32_0 = arith.constant 0 : i32
    %c0_i32_1 = arith.constant 0 : i32
    %c0_i32_2 = arith.constant 0 : i32
    return %arg0, %c0_i32, %c0_i32_0, %c0_i32_1 : i32, i32, i32, i32
  }
  func.func @transform_1(%arg0: i32) -> (i32, i32, i32, i32) {
    %c0_i32 = arith.constant 0 : i32
    %c0_i32_0 = arith.constant 0 : i32
    %c0_i32_1 = arith.constant 0 : i32
    %c0_i32_2 = arith.constant 0 : i32
    return %arg0, %c0_i32, %c0_i32_0, %c0_i32_1 : i32, i32, i32, i32
  }
}

</mosaic_0001>

<bundles_post_ra>
// kernel: tpu_custom_call.1
= control target key start
LH: loop header
LB: loop body
LE: loop exit
PB: predicated region body
PF: predicated region fallthrough
CT: control target
= control target key end

     0   :  { %6 = vsyncpa [#allocation3], 0  ;;  %s1309_s0 = inlined_call_operand.vmem [shape: f32[2,2,16,8], index: 0, kind: input, shape index: {}]   ;;  %s1310_s1 = inlined_call_operand.hbm [shape: f32[2,16,16,16], index: 1, kind: output, shape index: {}]  }
   0x1   :  { %8 = vsyncpa [#allocation3 + $0x1], 0  ;;  %s976_s6 = smov 0   ;;  %s978_s7 = smov 0  }
   0x2   :  { %s980_s8 = smov 0   ;;  %s982_s9 = smov 0  }
   0x3 LB: > { %s997_s10 = sadd.s32 4294967295, %s962_s9   ;;  %s753_s11 = sadd.s32 4294967294, %s962_s9   ;;  %s962_s9 = sphi %s982_s9, %s1316_s9   ;;  %s958_s8 = sphi %s980_s8, %s1315_s8   ;;  %s954_s7 = sphi %s978_s7, %s1314_s7   ;;  %s950_s6 = sphi %s976_s6, %s1313_s6  }
   0x4   : > { %s1001_s12 = sadd.s32 1, %s962_s9   ;;  %s47_s13 = sadd.s32 1, %s958_s8 }
   0x5   : > { %s44_s14 = ssub.s32 %s962_s9, %s1001_s12  ;;  %p57_p0 = scmp.ne.s32.totalorder %s958_s8, %s954_s7 }
   0x6   : > { %p45_p1 = scmp.eq.s32.totalorder %s44_s14, 0  ;;  %p58_p2 = scmp.eq.s32.totalorder %s997_s10, 1 }
   0x7   : > { %p63_p3 = scmp.ne.s32.totalorder %s954_s7, %s950_s6  ;;  %p64_p4 = scmp.eq.s32.totalorder %s753_s11, 1 }
   0x8   : > { %s1012_s15 = scalar_select %p45_p1, %s958_s8, %s47_s13  }
   0x9   : > { %p1014_p5 = por %p58_p2, %p57_p0  ;;  %p1018_p6 = por %p64_p4, %p63_p3 }
   0xa   : > { %p756_p7 = scmp.ge.s32.totalorder %s962_s9, 1  ;;  %p90_p8 = scmp.lt.s32.totalorder %s962_s9, 3 }
   0xc   : > { %p91_p9 = pnand %p756_p7, %p90_p8 }
   0xd   : > { %p110_p10 = scmp.lt.s32.totalorder (!%p91_p9), %s997_s10, 1  ;;  %s107_s23 = sand.u32 (!%p91_p9), 1, %s954_s7  }
   0xe   : > { %94 = sbr.rel (%p91_p9) target bundleno = 225 (0xe1), region = 24  ;;  %s757_s24 = sshll.u32 (!%p91_p9), %s107_s23, 8 }
   0xf   : > { %s1209_s25 = scalar_lea.vmem (!%p91_p9), [#allocation2], %s757_s24  ;;  %s858_s26 = sshll.u32 (!%p91_p9), %s997_s10, 8 }
  0x10   : > { %s687_s29 = scalar_lea.hbm (!%p91_p9), %s1310_s1, %s858_s26  ;;  %s688_s30 = sshll.u32 (!%p91_p9), %s1209_s25, 4  ;;  %s689_s30 = int_to_ptr.vmem [resolvable:$true] %s688_s30 }
  0x11   : > { %s690_s2 = sshll.u32 (!%p91_p9), %s687_s29, 4  ;;  %s676_s3 = scalar_lea.sflag (!%p91_p9), [#allocation3], %s107_s23  ;;  %s691_s2 = int_to_ptr.hbm [resolvable:$true] %s690_s2 }
  0x12   : > { %s914_s4 = sshra.s32 (!%p91_p9), %s691_s2, 4  ;;  %s920_s13 = scalar_lea.hbm (!%p91_p9), %s1310_s1, 512  ;;  %s915_s4 = int_to_ptr.hbm [resolvable:$true] %s914_s4 }
  0x13   : > { %v119_v0 = vlaneseq  ;;  %s111_s18 = scalar_select %p110_p10, %s997_s10, 1  ;;  %vm128_vm0 = vcmask 64512   ;;  %vm199_vm8 = vcmask 130048  }
  0x14   : > { %s916_s5 = scalar_lea.hbm %s915_s4, 256  ;;  %p921_p0 = scmp.lt.s32.totalorder %s915_s4, %s1310_s1 }
  0x15   : > { %s857_s19 = sshll.u32 %s111_s18, 5  ;;  %v1026_v1 = vand.u32 127, %v119_v0  ;;  %p917_p11 = scmp.ne.s32.totalorder %s915_s4, %s916_s5 }
  0x16   : > { %s114_s22 = scalar_lea.vmem %s1309_s0, %s857_s19  ;;  %p922_p1 = scmp.lt.s32.totalorder %s920_s13, %s916_s5 }
  0x17   : > { %v1031_v2 = vld [vmem:[%s114_s22 + $0x8] sm:$0xff]  ;;  %v1033_v3 = vld [vmem:[%s114_s22 + $0x18] sm:$0xff]  ;;  %v1039_v4 = vld [vmem:[%s114_s22] sm:$0xff]  ;;  %vm204_vm1 = vcmp.le.s32.totalorder %v1026_v1, 1  ;;  %vm121_vm2 = vcmp.le.s32.totalorder %v1026_v1, 0  ;;  %vm344_vm3 = vcmp.le.s32.totalorder %v1026_v1, 3  ;;  %p918_p12 = pnand %p917_p11, %p1014_p5 }
  0x18   : > { %768 = vmatpush.xpose.msk.msra.mxu2 %vm128_vm0, %v1031_v2  ;;  %772 = vmatpush.xpose.msk.msra.mxu3 %vm128_vm0, %v1033_v3  ;;  %v1041_v5 = vld [vmem:[%s114_s22 + $0x10] sm:$0xff]  ;;  %v207_v6 = vsel %vm204_vm1, %v1039_v4, 0.0  ;;  %v124_v8 = vsel %vm121_vm2, %v1039_v4, 0.0  ;;  %v208_v10 = vsel %vm204_vm1, %v1031_v2, 0.0  ;;  %v210_v11 = vsel %vm204_vm1, %v1033_v3, 0.0  ;;  %p923_p2 = por %p922_p1, %p921_p0 }
  0x19   : > { %760 = vmatpush.xpose.msk.msra.mxu0 %vm128_vm0, %v1031_v2  ;;  %764 = vmatpush.xpose.msk.msra.mxu1 %vm128_vm0, %v1033_v3  ;;  %v209_v7 = vsel %vm204_vm1, %v1041_v5, 0.0  ;;  %v126_v9 = vsel %vm121_vm2, %v1041_v5, 0.0  ;;  %v125_v12 = vsel %vm121_vm2, %v1031_v2, 0.0  ;;  %v127_v13 = vsel %vm121_vm2, %v1033_v3, 0.0  ;;  %p919_p13 = pneg %p918_p12 }
  0x1a   : > { %vm274_vm4 = vcmp.le.s32.totalorder %v1026_v1, 2  ;;  %v347_v14 = vsel %vm344_vm3, %v1039_v4, 0.0  ;;  %v349_v15 = vsel %vm344_vm3, %v1041_v5, 0.0  ;;  %v348_v18 = vsel %vm344_vm3, %v1031_v2, 0.0 }
  0x1b   : > { %v277_v16 = vsel %vm274_vm4, %v1039_v4, 0.0  ;;  %v279_v17 = vsel %vm274_vm4, %v1041_v5, 0.0  ;;  %v350_v19 = vsel %vm344_vm3, %v1033_v3, 0.0  ;;  %v278_v20 = vsel %vm274_vm4, %v1031_v2, 0.0  ;;  %p924_p3 = pnand %p923_p2, %p919_p13 }
  0x1c   : > { %769 = vmatpush.xpose.msk.msra.mxu2 %vm128_vm0, %v1039_v4  ;;  %773 = vmatpush.xpose.msk.msra.mxu3 %vm128_vm0, %v1041_v5  ;;  %v280_v21 = vsel %vm274_vm4, %v1033_v3, 0.0  ;;  %vm484_vm5 = vcmp.le.s32.totalorder %v1026_v1, 5  ;;  %vm414_vm6 = vcmp.le.s32.totalorder %v1026_v1, 4  ;;  %vm554_vm7 = vcmp.le.s32.totalorder %v1026_v1, 6 }
  0x1d   : > { %761 = vmatpush.xpose.msk.msra.mxu0 %vm128_vm0, %v1039_v4  ;;  %765 = vmatpush.xpose.msk.msra.mxu1 %vm128_vm0, %v1041_v5  ;;  %v487_v22 = vsel %vm484_vm5, %v1039_v4, 0.0  ;;  %v489_v23 = vsel %vm484_vm5, %v1041_v5, 0.0  ;;  %v417_v24 = vsel %vm414_vm6, %v1039_v4, 0.0  ;;  %v419_v25 = vsel %vm414_vm6, %v1041_v5, 0.0 }
  0x1e   : > { %v488_v26 = vsel %vm484_vm5, %v1031_v2, 0.0  ;;  %v490_v27 = vsel %vm484_vm5, %v1033_v3, 0.0  ;;  %v418_v28 = vsel %vm414_vm6, %v1031_v2, 0.0  ;;  %v420_v29 = vsel %vm414_vm6, %v1033_v3, 0.0 }
  0x1f   : > { %770 = vmatmul.msk.f32.vlgmr.msra.gmra.mxu2 %vm128_vm0, %v207_v6  ;;  %774 = vmatmul.msk.f32.vlgmr.msra.gmra.mxu3 %vm128_vm0, %v209_v7  ;;  %v557_v30 = vsel %vm554_vm7, %v1039_v4, 0.0  ;;  %v559_v31 = vsel %vm554_vm7, %v1041_v5, 0.0  ;;  %v558_v32 = vsel %vm554_vm7, %v1031_v2, 0.0  ;;  %v560_v33 = vsel %vm554_vm7, %v1033_v3, 0.0 }
  0x20   : > { %792 = vmatpush.xpose.msk.msrb.mxu2 %vm128_vm0, %v1031_v2  ;;  %796 = vmatpush.xpose.msk.msrb.mxu3 %vm128_vm0, %v1033_v3 }
  0x21   : > { %780 = vmatpush.xpose.msk.msrb.mxu0 %vm128_vm0, %v1031_v2  ;;  %784 = vmatpush.xpose.msk.msrb.mxu1 %vm128_vm0, %v1033_v3 }
  0x22   : > { %762 = vmatmul.msk.f32.vlgmr.msra.gmra.mxu0 %vm128_vm0, %v124_v8  ;;  %766 = vmatmul.msk.f32.vlgmr.msra.gmra.mxu1 %vm128_vm0, %v126_v9 }
  0x24   : > { %793 = vmatpush.xpose.msk.msrb.mxu2 %vm128_vm0, %v1039_v4  ;;  %797 = vmatpush.xpose.msk.msrb.mxu3 %vm128_vm0, %v1041_v5 }
  0x25   : > { %781 = vmatpush.xpose.msk.msrb.mxu0 %vm128_vm0, %v1039_v4  ;;  %785 = vmatpush.xpose.msk.msrb.mxu1 %vm128_vm0, %v1041_v5 }
  0x27   : > { %771 = vmatmul.msk.f32.gmra.mxu2 %vm128_vm0, %v208_v10  ;;  %775 = vmatmul.msk.f32.gmra.mxu3 %vm128_vm0, %v210_v11 }
  0x28   : > { %816 = vmatpush.xpose.msk.msra.mxu2 %vm128_vm0, %v1031_v2  ;;  %820 = vmatpush.xpose.msk.msra.mxu3 %vm128_vm0, %v1033_v3 }
  0x29   : > { %804 = vmatpush.xpose.msk.msra.mxu0 %vm128_vm0, %v1031_v2  ;;  %808 = vmatpush.xpose.msk.msra.mxu1 %vm128_vm0, %v1033_v3 }
  0x2a   : > { %763 = vmatmul.msk.f32.gmra.mxu0 %vm128_vm0, %v125_v12  ;;  %767 = vmatmul.msk.f32.gmra.mxu1 %vm128_vm0, %v127_v13 }
  0x2c   : > { %817 = vmatpush.xpose.msk.msra.mxu2 %vm128_vm0, %v1039_v4  ;;  %821 = vmatpush.xpose.msk.msra.mxu3 %vm128_vm0, %v1041_v5 }
  0x2d   : > { %805 = vmatpush.xpose.msk.msra.mxu0 %vm128_vm0, %v1039_v4  ;;  %809 = vmatpush.xpose.msk.msra.mxu1 %vm128_vm0, %v1041_v5 }
  0x2f   : > { %794 = vmatmul.msk.f32.vlgmr.msrb.gmra.mxu2 %vm128_vm0, %v347_v14  ;;  %798 = vmatmul.msk.f32.vlgmr.msrb.gmra.mxu3 %vm128_vm0, %v349_v15 }
  0x30   : > { %840 = vmatpush.xpose.msk.msrb.mxu2 %vm128_vm0, %v1031_v2  ;;  %844 = vmatpush.xpose.msk.msrb.mxu3 %vm128_vm0, %v1033_v3 }
  0x32   : > { %782 = vmatmul.msk.f32.vlgmr.msrb.gmra.mxu0 %vm128_vm0, %v277_v16  ;;  %786 = vmatmul.msk.f32.vlgmr.msrb.gmra.mxu1 %vm128_vm0, %v279_v17 }
  0x33   : > { %828 = vmatpush.xpose.msk.msrb.mxu0 %vm128_vm0, %v1031_v2  ;;  %832 = vmatpush.xpose.msk.msrb.mxu1 %vm128_vm0, %v1033_v3 }
  0x34   : > { %841 = vmatpush.xpose.msk.msrb.mxu2 %vm128_vm0, %v1039_v4  ;;  %845 = vmatpush.xpose.msk.msrb.mxu3 %vm128_vm0, %v1041_v5 }
  0x37   : > { %829 = vmatpush.xpose.msk.msrb.mxu0 %vm128_vm0, %v1039_v4  ;;  %833 = vmatpush.xpose.msk.msrb.mxu1 %vm128_vm0, %v1041_v5 }
  0x38   : > { %795 = vmatmul.msk.f32.gmra.mxu2 %vm128_vm0, %v348_v18  ;;  %799 = vmatmul.msk.f32.gmra.mxu3 %vm128_vm0, %v350_v19 }
  0x3a   : > { %783 = vmatmul.msk.f32.gmra.mxu0 %vm128_vm0, %v278_v20  ;;  %787 = vmatmul.msk.f32.gmra.mxu1 %vm128_vm0, %v280_v21 }
  0x40   : > { %818 = vmatmul.msk.f32.vlgmr.msra.gmra.mxu2 %vm128_vm0, %v487_v22  ;;  %822 = vmatmul.msk.f32.vlgmr.msra.gmra.mxu3 %vm128_vm0, %v489_v23 }
  0x42   : > { %806 = vmatmul.msk.f32.vlgmr.msra.gmra.mxu0 %vm128_vm0, %v417_v24  ;;  %810 = vmatmul.msk.f32.vlgmr.msra.gmra.mxu1 %vm128_vm0, %v419_v25 }
  0x48   : > { %819 = vmatmul.msk.f32.gmra.mxu2 %vm128_vm0, %v488_v26  ;;  %823 = vmatmul.msk.f32.gmra.mxu3 %vm128_vm0, %v490_v27 }
  0x4a   : > { %807 = vmatmul.msk.f32.gmra.mxu0 %vm128_vm0, %v418_v28  ;;  %811 = vmatmul.msk.f32.gmra.mxu1 %vm128_vm0, %v420_v29 }
  0x50   : > { %842 = vmatmul.msk.f32.vlgmr.msrb.gmra.mxu2 %vm128_vm0, %v1039_v4  ;;  %846 = vmatmul.msk.f32.vlgmr.msrb.gmra.mxu3 %vm128_vm0, %v1041_v5 }
  0x52   : > { %830 = vmatmul.msk.f32.vlgmr.msrb.gmra.mxu0 %vm128_vm0, %v557_v30  ;;  %834 = vmatmul.msk.f32.vlgmr.msrb.gmra.mxu1 %vm128_vm0, %v559_v31 }
  0x58   : > { %843 = vmatmul.msk.f32.gmra.mxu2 %vm128_vm0, %v1031_v2  ;;  %847 = vmatmul.msk.f32.gmra.mxu3 %vm128_vm0, %v1033_v3 }
  0x5a   : > { %831 = vmatmul.msk.f32.gmra.mxu0 %vm128_vm0, %v558_v32  ;;  %835 = vmatmul.msk.f32.gmra.mxu1 %vm128_vm0, %v560_v33 }
  0x9f   : > { %v158_v34 = vpop.f32.mrf.mxu0  ;;  %v193_v35 = vpop.f32.mrf.mxu1 }
  0xa0   : > { %200 = vst.msk [vmem:[%s1209_s25] sm:$0xff] %vm199_vm8, %v158_v34 }
  0xa1   : > { %202 = vst.msk [vmem:[%s1209_s25 + $0x10] sm:$0xff] %vm199_vm8, %v193_v35 }
  0xa2   : > { %v234_v36 = vpop.f32.mrf.mxu2  ;;  %v263_v37 = vpop.f32.mrf.mxu3 }
  0xa3   : > { %776 = vst.msk [vmem:[%s1209_s25 + $0x20] sm:$0xff] %vm199_vm8, %v234_v36 }
  0xa4   : > { %778 = vst.msk [vmem:[%s1209_s25 + $0x30] sm:$0xff] %vm199_vm8, %v263_v37 }
  0xa7   : > { %v161_v38 = vpop.f32.mrf.mxu0  ;;  %v196_v39 = vpop.f32.mrf.mxu1 }
  0xa8   : > { %201 = vst.msk [vmem:[%s1209_s25 + $0x8] sm:$0xff] %vm199_vm8, %v161_v38 }
  0xa9   : > { %203 = vst.msk [vmem:[%s1209_s25 + $0x18] sm:$0xff] %vm199_vm8, %v196_v39 }
  0xaa   : > { %v237_v40 = vpop.f32.mrf.mxu2  ;;  %v266_v41 = vpop.f32.mrf.mxu3 }
  0xab   : > { %777 = vst.msk [vmem:[%s1209_s25 + $0x28] sm:$0xff] %vm199_vm8, %v237_v40 }
  0xac   : > { %779 = vst.msk [vmem:[%s1209_s25 + $0x38] sm:$0xff] %vm199_vm8, %v266_v41 }
  0xaf   : > { %v304_v42 = vpop.f32.mrf.mxu0  ;;  %v333_v43 = vpop.f32.mrf.mxu1 }
  0xb0   : > { %788 = vst.msk [vmem:[%s1209_s25 + $0x40] sm:$0xff] %vm199_vm8, %v304_v42 }
  0xb1   : > { %790 = vst.msk [vmem:[%s1209_s25 + $0x50] sm:$0xff] %vm199_vm8, %v333_v43 }
  0xb2   : > { %v374_v44 = vpop.f32.mrf.mxu2  ;;  %v403_v45 = vpop.f32.mrf.mxu3 }
  0xb3   : > { %800 = vst.msk [vmem:[%s1209_s25 + $0x60] sm:$0xff] %vm199_vm8, %v374_v44 }
  0xb4   : > { %802 = vst.msk [vmem:[%s1209_s25 + $0x70] sm:$0xff] %vm199_vm8, %v403_v45 }
  0xb7   : > { %v307_v46 = vpop.f32.mrf.mxu0  ;;  %v336_v47 = vpop.f32.mrf.mxu1 }
  0xb8   : > { %789 = vst.msk [vmem:[%s1209_s25 + $0x48] sm:$0xff] %vm199_vm8, %v307_v46 }
  0xb9   : > { %791 = vst.msk [vmem:[%s1209_s25 + $0x58] sm:$0xff] %vm199_vm8, %v336_v47 }
  0xbb   : > { %v377_v48 = vpop.f32.mrf.mxu2  ;;  %v406_v49 = vpop.f32.mrf.mxu3 }
  0xbc   : > { %801 = vst.msk [vmem:[%s1209_s25 + $0x68] sm:$0xff] %vm199_vm8, %v377_v48 }
  0xbd   : > { %803 = vst.msk [vmem:[%s1209_s25 + $0x78] sm:$0xff] %vm199_vm8, %v406_v49 }
  0xbf   : > { %v444_v50 = vpop.f32.mrf.mxu0  ;;  %v473_v51 = vpop.f32.mrf.mxu1 }
  0xc0   : > { %812 = vst.msk [vmem:[%s1209_s25 + $0x80] sm:$0xff] %vm199_vm8, %v444_v50 }
  0xc1   : > { %814 = vst.msk [vmem:[%s1209_s25 + $0x90] sm:$0xff] %vm199_vm8, %v473_v51 }
  0xc3   : > { %v514_v52 = vpop.f32.mrf.mxu2  ;;  %v543_v53 = vpop.f32.mrf.mxu3 }
  0xc4   : > { %824 = vst.msk [vmem:[%s1209_s25 + $0xa0] sm:$0xff] %vm199_vm8, %v514_v52 }
  0xc5   : > { %826 = vst.msk [vmem:[%s1209_s25 + $0xb0] sm:$0xff] %vm199_vm8, %v543_v53 }
  0xc7   : > { %v447_v54 = vpop.f32.mrf.mxu0  ;;  %v476_v55 = vpop.f32.mrf.mxu1 }
  0xc8   : > { %813 = vst.msk [vmem:[%s1209_s25 + $0x88] sm:$0xff] %vm199_vm8, %v447_v54 }
  0xc9   : > { %815 = vst.msk [vmem:[%s1209_s25 + $0x98] sm:$0xff] %vm199_vm8, %v476_v55 }
  0xcb   : > { %v517_v56 = vpop.f32.mrf.mxu2  ;;  %v546_v57 = vpop.f32.mrf.mxu3 }
  0xcc   : > { %825 = vst.msk [vmem:[%s1209_s25 + $0xa8] sm:$0xff] %vm199_vm8, %v517_v56 }
  0xcd   : > { %827 = vst.msk [vmem:[%s1209_s25 + $0xb8] sm:$0xff] %vm199_vm8, %v546_v57 }
  0xcf   : > { %v584_v58 = vpop.f32.mrf.mxu0  ;;  %v613_v59 = vpop.f32.mrf.mxu1 }
  0xd0   : > { %836 = vst.msk [vmem:[%s1209_s25 + $0xc0] sm:$0xff] %vm199_vm8, %v584_v58 }
  0xd1   : > { %838 = vst.msk [vmem:[%s1209_s25 + $0xd0] sm:$0xff] %vm199_vm8, %v613_v59 }
  0xd3   : > { %v641_v60 = vpop.f32.mrf.mxu2  ;;  %v664_v61 = vpop.f32.mrf.mxu3 }
  0xd4   : > { %848 = vst.msk [vmem:[%s1209_s25 + $0xe0] sm:$0xff] %vm199_vm8, %v641_v60 }
  0xd5   : > { %850 = vst.msk [vmem:[%s1209_s25 + $0xf0] sm:$0xff] %vm199_vm8, %v664_v61 }
  0xd7   : > { %v587_v62 = vpop.f32.mrf.mxu0  ;;  %v616_v63 = vpop.f32.mrf.mxu1 }
  0xd8   : > { %837 = vst.msk [vmem:[%s1209_s25 + $0xc8] sm:$0xff] %vm199_vm8, %v587_v62 }
  0xd9   : > { %839 = vst.msk [vmem:[%s1209_s25 + $0xd8] sm:$0xff] %vm199_vm8, %v616_v63 }
  0xdb   : > { %v644_v0 = vpop.f32.mrf.mxu2  ;;  %v667_v1 = vpop.f32.mrf.mxu3 }
  0xdc   : > { %849 = vst.msk [vmem:[%s1209_s25 + $0xe8] sm:$0xff] %vm199_vm8, %v644_v0 }
  0xdd   : > { %851 = vst.msk [vmem:[%s1209_s25 + $0xf8] sm:$0xff] %vm199_vm8, %v667_v1 }
  0xde   : > { %927 = shalt.err (!%p924_p3)
}
  0xdf   : > { %s964_s19 = smov 128   ;;  %s965_s20 = smov 8  }
  0xe0   : > { %859 = dma.vmem_to_hbm [thread:$0]  (%p1014_p5), %s689_s30, 4096, %s691_s2, %s676_s3, %s964_s19, %s964_s19, %s965_s20  }
  0xe1 PF: > { %p865_p4 = scmp.ge.s32.totalorder %s962_s9, 2  ;;  %s705_s21 = sand.u32 1, %s950_s6  }
  0xe2   : > { %s706_s22 = scalar_lea.sflag [#allocation3], %s705_s21 }
  0xe3   : > { %p862_p7 = pnand %p865_p4, %p1018_p6 }
  0xe5   : > { %p863_p8 = pneg %p862_p7 }
  0xe7   : > { %945 = dma.done.wait (%p863_p8), %s706_s22, 4096  }
  0xe8   : > { %947 = vsyncadd (%p863_p8), %s706_s22, 4294963200  ;;  %p11_p9 = scmp.ge.s32.totalorder %s1001_s12, 4   ;;  %s1313_s6 = smov %s954_s7 }
  0xe9   : > { %s1314_s7 = smov %s958_s8  ;;  %s1315_s8 = smov %s1012_s15 }
  0xea   : > { %s1316_s9 = smov %s1001_s12  ;;  %13 = sbr.rel (!%p11_p9) target bundleno = 3 (0x3), region = 66 }
  0xef   :  { %712 = vsyncpa [#allocation3], 1 }
  0xf0   :  { %714 = vsyncpa [#allocation3 + $0x1], 1 }

</bundles_post_ra>
